<compile_context>
chip_gen: v7x
topology: tpu7x:2x2x1
jax: 0.10.0
libtpu: 0.0.40
codegen_flags: <defaults>
</compile_context>

<pallas_src>
import functools

import jax
import jax.numpy as jnp
from jax.experimental import pallas as pl
from jax.experimental.pallas import tpu as pltpu

HIDDEN = 128
N_HIDDEN2_APPLICATIONS = 7  # hidden2 is applied seven times in forward()


def _round_up(x: int, m: int) -> int:
    return ((x + m - 1) // m) * m


def critic_kernel(s_ref, a_ref, w1s_ref, w1a_ref, b1_ref, w2_ref, b2_ref,
                  wo_ref, out_ref):
    TB = s_ref.shape[0]  # batch tile (block shape)

    # hidden1 with the concat fused in: cat(s,a) @ W1 == s @ W1[:Ds] + a @ W1[Ds:]
    # bf16 operands on the MXU, f32 accumulation.
    h = jnp.dot(s_ref[...].astype(jnp.bfloat16), w1s_ref[...],
                preferred_element_type=jnp.float32)
    h = h + jnp.dot(a_ref[...].astype(jnp.bfloat16), w1a_ref[...],
                    preferred_element_type=jnp.float32)
    h = jnp.maximum(h + b1_ref[...], 0.0)

    # hidden2 applied 7 times with shared weights, relu each time.
    # b2 added directly as a (1, 128) operand: Mosaic keeps it sublane-replicated
    # (1 vreg) instead of a materialized (TB, 128) broadcast.
    w2 = w2_ref[...]          # bf16, resident across the batch grid
    b2 = b2_ref[...]          # f32 (1, HIDDEN)
    for _ in range(N_HIDDEN2_APPLICATIONS):
        h = jnp.maximum(
            jnp.dot(h.astype(jnp.bfloat16), w2,
                    preferred_element_type=jnp.float32) + b2, 0.0)

    # 128 -> 1 head: elementwise mul + lane reduction on VPU/XLU (no 1-column
    # MXU push); stored lane-dense as a (1, TB) row.
    v = jnp.sum(h * wo_ref[...], axis=-1)          # (TB,) f32
    out_ref[...] = v.reshape(1, TB)


@functools.partial(jax.jit, static_argnames=("block_b",))
def critic_forward(state, action, params, *, block_b: int = 1024):
    """Pallas forward: value = Critic(state, action)."""
    state = state.astype(jnp.float32)
    action = action.astype(jnp.float32)
    w1, b1, w2, b2, wo_row, bo = params

    B, state_dim = state.shape
    action_dim = action.shape[1]

    # Split W1 so the concat never materializes; cast weights to bf16 once.
    w1s = w1[:state_dim].astype(jnp.bfloat16)
    w1a = w1[state_dim:].astype(jnp.bfloat16)
    w2_bf = w2.astype(jnp.bfloat16)

    # Batch tile: big enough to amortize the ~0.35 us/step overhead, but chosen
    # so large batches produce >=2 grid steps (both v7x TensorCores get work).
    if B <= 8:
        TB = B                                        # single full-batch block
    else:
        TB = max(8, min(block_b, _round_up((B + 1) // 2, 8)))
    num_tiles = (B + TB - 1) // TB  # partial last block handled by the pipeline

    const = lambda i: (0, 0)  # weights/biases: resident across the batch grid

    out = pl.pallas_call(
        critic_kernel,
        out_shape=jax.ShapeDtypeStruct((num_tiles, TB), jnp.float32),
        grid=(num_tiles,),
        in_specs=[
            pl.BlockSpec((TB, state_dim), lambda i: (i, 0)),   # state tile
            pl.BlockSpec((TB, action_dim), lambda i: (i, 0)),  # action tile
            pl.BlockSpec((state_dim, HIDDEN), const),          # W1[:Ds] (bf16)
            pl.BlockSpec((action_dim, HIDDEN), const),         # W1[Ds:] (bf16)
            pl.BlockSpec((1, HIDDEN), const),                  # b1
            pl.BlockSpec((HIDDEN, HIDDEN), const),             # W2 (bf16)
            pl.BlockSpec((1, HIDDEN), const),                  # b2
            pl.BlockSpec((1, HIDDEN), const),                  # wo (row)
        ],
        out_specs=pl.BlockSpec((1, TB), lambda i: (i, 0)),     # lane-dense rows
        compiler_params=pltpu.CompilerParams(
            dimension_semantics=("parallel",)),
    )(state, action, w1s, w1a, b1, w2_bf, b2, wo_row)

    # Lane-dense output comes back as (num_tiles, TB): flatten, drop the rows
    # past B (clipped/garbage tail of the last block), add the scalar out-bias.
    value = out.reshape(num_tiles * TB, 1)[:B]
    return value + bo


def init_critic_params(key, in_dim, init_w: float = 0.003):
    """Deterministic init mirroring PyTorch nn.Linear defaults + custom out init."""
    k1, k2, k3, k4, k5, k6 = jax.random.split(key, 6)

    def linear_init(kw, kb, fan_in, fan_out):
        bound = 1.0 / jnp.sqrt(fan_in)
        w = jax.random.uniform(kw, (fan_in, fan_out), jnp.float32, -bound, bound)
        b = jax.random.uniform(kb, (1, fan_out), jnp.float32, -bound, bound)
        return w, b

    w1, b1 = linear_init(k1, k2, in_dim, HIDDEN)
    w2, b2 = linear_init(k3, k4, HIDDEN, HIDDEN)
    # out layer: uniform(-init_w, init_w); stored pre-transposed as a (1, 128) row.
    wo_row = jax.random.uniform(k5, (1, HIDDEN), jnp.float32, -init_w, init_w)
    bo = jax.random.uniform(k6, (1, 1), jnp.float32, -init_w, init_w)
    return (w1, b1, w2, b2, wo_row, bo)


def critic_reference(state, action, params):
    """Pure-JAX f32 reference matching the PyTorch forward exactly."""
    w1, b1, w2, b2, wo_row, bo = params
    x = jnp.concatenate([state, action], axis=-1).astype(jnp.float32)
    h = jnp.maximum(x @ w1 + b1, 0.0)
    for _ in range(N_HIDDEN2_APPLICATIONS):
        h = jnp.maximum(h @ w2 + b2, 0.0)
    return h @ wo_row.T + bo


if __name__ == "__main__":
    key = jax.random.PRNGKey(0)
    k_params, k_state, k_action = jax.random.split(key, 3)

    batch = 8
    state_dim = 24
    action_dim = 8
    in_dim = state_dim + action_dim  # 32

    params = init_critic_params(k_params, in_dim)
    state = jax.random.normal(k_state, (batch, state_dim), jnp.float32)
    action = jax.random.normal(k_action, (batch, action_dim), jnp.float32)

    value = jax.block_until_ready(critic_forward(state, action, params))
    ref = critic_reference(state, action, params)
    assert value.shape == (batch, 1)
    assert jnp.allclose(value, ref, atol=1e-2, rtol=1e-2)  # bf16 operands

    # Multi-tile batch grid with a partial last block (no wrapper-side padding).
    batch2 = 20
    k_s2, k_a2 = jax.random.split(jax.random.PRNGKey(1))
    state2 = jax.random.normal(k_s2, (batch2, state_dim), jnp.float32)
    action2 = jax.random.normal(k_a2, (batch2, action_dim), jnp.float32)
    value2 = jax.block_until_ready(
        critic_forward(state2, action2, params, block_b=8))
    ref2 = critic_reference(state2, action2, params)
    assert value2.shape == (batch2, 1)
    assert jnp.allclose(value2, ref2, atol=1e-2, rtol=1e-2)

    # Larger batch: two grid steps (both v7x TensorCores busy) + ragged tail.
    batch3 = 300
    k_s3, k_a3 = jax.random.split(jax.random.PRNGKey(2))
    state3 = jax.random.normal(k_s3, (batch3, state_dim), jnp.float32)
    action3 = jax.random.normal(k_a3, (batch3, action_dim), jnp.float32)
    value3 = jax.block_until_ready(critic_forward(state3, action3, params))
    ref3 = critic_reference(state3, action3, params)
    assert value3.shape == (batch3, 1)
    assert jnp.allclose(value3, ref3, atol=1e-2, rtol=1e-2)

    print("KERNEL_OK")
</pallas_src>

<mosaic_0001>
module attributes {stable_mosaic.version = 11 : i64} {
  func.func @critic_kernel(%arg0: i32, %arg1: memref<8x24xf32, #tpu.memory_space<vmem>>, %arg2: memref<8x8xf32, #tpu.memory_space<vmem>>, %arg3: memref<24x128xbf16, #tpu.memory_space<vmem>>, %arg4: memref<8x128xbf16, #tpu.memory_space<vmem>>, %arg5: memref<1x128xf32, #tpu.memory_space<vmem>>, %arg6: memref<128x128xbf16, #tpu.memory_space<vmem>>, %arg7: memref<1x128xf32, #tpu.memory_space<vmem>>, %arg8: memref<1x128xf32, #tpu.memory_space<vmem>>, %arg9: memref<1x8xf32, #tpu.memory_space<vmem>>) attributes {dimension_semantics = [#tpu.dimension_semantics<parallel>], iteration_bounds = array<i64: 1>, scalar_prefetch = 0 : i64, scratch_operands = 0 : i64, tpu.core_type = #tpu.core_type<tc>, window_params = [{transform_indices = @transform_0, window_bounds = array<i64: 8, 24>}, {transform_indices = @transform_1, window_bounds = array<i64: 8, 8>}, {pipeline_mode = #tpu.pipeline_mode<synchronous>, transform_indices = @transform_2, window_bounds = array<i64: 24, 128>}, {pipeline_mode = #tpu.pipeline_mode<synchronous>, transform_indices = @transform_3, window_bounds = array<i64: 8, 128>}, {pipeline_mode = #tpu.pipeline_mode<synchronous>, transform_indices = @transform_4, window_bounds = array<i64: 1, 128>}, {pipeline_mode = #tpu.pipeline_mode<synchronous>, transform_indices = @transform_5, window_bounds = array<i64: 128, 128>}, {pipeline_mode = #tpu.pipeline_mode<synchronous>, transform_indices = @transform_6, window_bounds = array<i64: 1, 128>}, {pipeline_mode = #tpu.pipeline_mode<synchronous>, transform_indices = @transform_7, window_bounds = array<i64: 1, 128>}, {transform_indices = @transform_8, window_bounds = array<i64: 1, 8>}]} {
    %c0 = arith.constant 0 : index
    %c0_0 = arith.constant 0 : index
    %0 = vector.load %arg1[%c0, %c0_0] : memref<8x24xf32, #tpu.memory_space<vmem>>, vector<8x24xf32>
    %1 = arith.truncf %0 : vector<8x24xf32> to vector<8x24xbf16>
    %c0_1 = arith.constant 0 : index
    %c0_2 = arith.constant 0 : index
    %2 = vector.load %arg3[%c0_1, %c0_2] : memref<24x128xbf16, #tpu.memory_space<vmem>>, vector<24x128xbf16>
    %cst = arith.constant dense<0.000000e+00> : vector<8x128xf32>
    %3 = tpu.matmul %1, %2, %cst {dimension_numbers = #tpu.dot_dimension_numbers<[1], [0], [0], [1], [0, 0, 1, 1], [], []>} : vector<8x24xbf16>, vector<24x128xbf16>, vector<8x128xf32> -> vector<8x128xf32>
    %c0_3 = arith.constant 0 : index
    %c0_4 = arith.constant 0 : index
    %4 = vector.load %arg2[%c0_3, %c0_4] : memref<8x8xf32, #tpu.memory_space<vmem>>, vector<8x8xf32>
    %5 = arith.truncf %4 : vector<8x8xf32> to vector<8x8xbf16>
    %c0_5 = arith.constant 0 : index
    %c0_6 = arith.constant 0 : index
    %6 = vector.load %arg4[%c0_5, %c0_6] : memref<8x128xbf16, #tpu.memory_space<vmem>>, vector<8x128xbf16>
    %cst_7 = arith.constant dense<0.000000e+00> : vector<8x128xf32>
    %7 = tpu.matmul %5, %6, %cst_7 {dimension_numbers = #tpu.dot_dimension_numbers<[1], [0], [0], [1], [0, 0, 1, 1], [], []>} : vector<8x8xbf16>, vector<8x128xbf16>, vector<8x128xf32> -> vector<8x128xf32>
    %8 = arith.addf %3, %7 : vector<8x128xf32>
    %c0_8 = arith.constant 0 : index
    %c0_9 = arith.constant 0 : index
    %9 = vector.load %arg5[%c0_8, %c0_9] : memref<1x128xf32, #tpu.memory_space<vmem>>, vector<1x128xf32>
    %10 = vector.broadcast %9 : vector<1x128xf32> to vector<8x128xf32>
    %11 = arith.addf %8, %10 : vector<8x128xf32>
    %cst_10 = arith.constant 0.000000e+00 : f32
    %12 = vector.broadcast %cst_10 : f32 to vector<8x128xf32>
    %13 = arith.maximumf %11, %12 : vector<8x128xf32>
    %c0_11 = arith.constant 0 : index
    %c0_12 = arith.constant 0 : index
    %14 = vector.load %arg6[%c0_11, %c0_12] : memref<128x128xbf16, #tpu.memory_space<vmem>>, vector<128x128xbf16>
    %c0_13 = arith.constant 0 : index
    %c0_14 = arith.constant 0 : index
    %15 = vector.load %arg7[%c0_13, %c0_14] : memref<1x128xf32, #tpu.memory_space<vmem>>, vector<1x128xf32>
    %16 = arith.truncf %13 : vector<8x128xf32> to vector<8x128xbf16>
    %cst_15 = arith.constant dense<0.000000e+00> : vector<8x128xf32>
    %17 = tpu.matmul %16, %14, %cst_15 {dimension_numbers = #tpu.dot_dimension_numbers<[1], [0], [0], [1], [0, 0, 1, 1], [], []>} : vector<8x128xbf16>, vector<128x128xbf16>, vector<8x128xf32> -> vector<8x128xf32>
    %18 = vector.broadcast %15 : vector<1x128xf32> to vector<8x128xf32>
    %19 = arith.addf %17, %18 : vector<8x128xf32>
    %cst_16 = arith.constant 0.000000e+00 : f32
    %20 = vector.broadcast %cst_16 : f32 to vector<8x128xf32>
    %21 = arith.maximumf %19, %20 : vector<8x128xf32>
    %22 = arith.truncf %21 : vector<8x128xf32> to vector<8x128xbf16>
    %cst_17 = arith.constant dense<0.000000e+00> : vector<8x128xf32>
    %23 = tpu.matmul %22, %14, %cst_17 {dimension_numbers = #tpu.dot_dimension_numbers<[1], [0], [0], [1], [0, 0, 1, 1], [], []>} : vector<8x128xbf16>, vector<128x128xbf16>, vector<8x128xf32> -> vector<8x128xf32>
    %24 = vector.broadcast %15 : vector<1x128xf32> to vector<8x128xf32>
    %25 = arith.addf %23, %24 : vector<8x128xf32>
    %cst_18 = arith.constant 0.000000e+00 : f32
    %26 = vector.broadcast %cst_18 : f32 to vector<8x128xf32>
    %27 = arith.maximumf %25, %26 : vector<8x128xf32>
    %28 = arith.truncf %27 : vector<8x128xf32> to vector<8x128xbf16>
    %cst_19 = arith.constant dense<0.000000e+00> : vector<8x128xf32>
    %29 = tpu.matmul %28, %14, %cst_19 {dimension_numbers = #tpu.dot_dimension_numbers<[1], [0], [0], [1], [0, 0, 1, 1], [], []>} : vector<8x128xbf16>, vector<128x128xbf16>, vector<8x128xf32> -> vector<8x128xf32>
    %30 = vector.broadcast %15 : vector<1x128xf32> to vector<8x128xf32>
    %31 = arith.addf %29, %30 : vector<8x128xf32>
    %cst_20 = arith.constant 0.000000e+00 : f32
    %32 = vector.broadcast %cst_20 : f32 to vector<8x128xf32>
    %33 = arith.maximumf %31, %32 : vector<8x128xf32>
    %34 = arith.truncf %33 : vector<8x128xf32> to vector<8x128xbf16>
    %cst_21 = arith.constant dense<0.000000e+00> : vector<8x128xf32>
    %35 = tpu.matmul %34, %14, %cst_21 {dimension_numbers = #tpu.dot_dimension_numbers<[1], [0], [0], [1], [0, 0, 1, 1], [], []>} : vector<8x128xbf16>, vector<128x128xbf16>, vector<8x128xf32> -> vector<8x128xf32>
    %36 = vector.broadcast %15 : vector<1x128xf32> to vector<8x128xf32>
    %37 = arith.addf %35, %36 : vector<8x128xf32>
    %cst_22 = arith.constant 0.000000e+00 : f32
    %38 = vector.broadcast %cst_22 : f32 to vector<8x128xf32>
    %39 = arith.maximumf %37, %38 : vector<8x128xf32>
    %40 = arith.truncf %39 : vector<8x128xf32> to vector<8x128xbf16>
    %cst_23 = arith.constant dense<0.000000e+00> : vector<8x128xf32>
    %41 = tpu.matmul %40, %14, %cst_23 {dimension_numbers = #tpu.dot_dimension_numbers<[1], [0], [0], [1], [0, 0, 1, 1], [], []>} : vector<8x128xbf16>, vector<128x128xbf16>, vector<8x128xf32> -> vector<8x128xf32>
    %42 = vector.broadcast %15 : vector<1x128xf32> to vector<8x128xf32>
    %43 = arith.addf %41, %42 : vector<8x128xf32>
    %cst_24 = arith.constant 0.000000e+00 : f32
    %44 = vector.broadcast %cst_24 : f32 to vector<8x128xf32>
    %45 = arith.maximumf %43, %44 : vector<8x128xf32>
    %46 = arith.truncf %45 : vector<8x128xf32> to vector<8x128xbf16>
    %cst_25 = arith.constant dense<0.000000e+00> : vector<8x128xf32>
    %47 = tpu.matmul %46, %14, %cst_25 {dimension_numbers = #tpu.dot_dimension_numbers<[1], [0], [0], [1], [0, 0, 1, 1], [], []>} : vector<8x128xbf16>, vector<128x128xbf16>, vector<8x128xf32> -> vector<8x128xf32>
    %48 = vector.broadcast %15 : vector<1x128xf32> to vector<8x128xf32>
    %49 = arith.addf %47, %48 : vector<8x128xf32>
    %cst_26 = arith.constant 0.000000e+00 : f32
    %50 = vector.broadcast %cst_26 : f32 to vector<8x128xf32>
    %51 = arith.maximumf %49, %50 : vector<8x128xf32>
    %52 = arith.truncf %51 : vector<8x128xf32> to vector<8x128xbf16>
    %cst_27 = arith.constant dense<0.000000e+00> : vector<8x128xf32>
    %53 = tpu.matmul %52, %14, %cst_27 {dimension_numbers = #tpu.dot_dimension_numbers<[1], [0], [0], [1], [0, 0, 1, 1], [], []>} : vector<8x128xbf16>, vector<128x128xbf16>, vector<8x128xf32> -> vector<8x128xf32>
    %54 = vector.broadcast %15 : vector<1x128xf32> to vector<8x128xf32>
    %55 = arith.addf %53, %54 : vector<8x128xf32>
    %cst_28 = arith.constant 0.000000e+00 : f32
    %56 = vector.broadcast %cst_28 : f32 to vector<8x128xf32>
    %57 = arith.maximumf %55, %56 : vector<8x128xf32>
    %c0_29 = arith.constant 0 : index
    %c0_30 = arith.constant 0 : index
    %58 = vector.load %arg8[%c0_29, %c0_30] : memref<1x128xf32, #tpu.memory_space<vmem>>, vector<1x128xf32>
    %59 = vector.broadcast %58 : vector<1x128xf32> to vector<8x128xf32>
    %60 = arith.mulf %57, %59 : vector<8x128xf32>
    %cst_31 = arith.constant dense<0.000000e+00> : vector<8xf32>
    %61 = vector.multi_reduction <add>, %60, %cst_31 [1] : vector<8x128xf32> to vector<8xf32>
    %62 = vector.shape_cast %61 : vector<8xf32> to vector<1x8xf32>
    %c0_32 = arith.constant 0 : index
    %c0_33 = arith.constant 0 : index
    %63 = vector.load %arg9[%c0_32, %c0_33] : memref<1x8xf32, #tpu.memory_space<vmem>>, vector<1x8xf32>
    tpu.vector_store %arg9[%c0_32, %c0_33], %62 {strides = array<i32>} : memref<1x8xf32, #tpu.memory_space<vmem>>, vector<1x8xf32>,
    return
  }
  func.func @transform_0(%arg0: i32) -> (i32, i32) {
    %c0_i32 = arith.constant 0 : i32
    %c0_i32_0 = arith.constant 0 : i32
    return %arg0, %c0_i32 : i32, i32
  }
  func.func @transform_1(%arg0: i32) -> (i32, i32) {
    %c0_i32 = arith.constant 0 : i32
    %c0_i32_0 = arith.constant 0 : i32
    return %arg0, %c0_i32 : i32, i32
  }
  func.func @transform_2(%arg0: i32) -> (i32, i32) {
    %c0_i32 = arith.constant 0 : i32
    %c0_i32_0 = arith.constant 0 : i32
    %c0_i32_1 = arith.constant 0 : i32
    return %c0_i32, %c0_i32_0 : i32, i32
  }
  func.func @transform_3(%arg0: i32) -> (i32, i32) {
    %c0_i32 = arith.constant 0 : i32
    %c0_i32_0 = arith.constant 0 : i32
    %c0_i32_1 = arith.constant 0 : i32
    return %c0_i32, %c0_i32_0 : i32, i32
  }
  func.func @transform_4(%arg0: i32) -> (i32, i32) {
    %c0_i32 = arith.constant 0 : i32
    %c0_i32_0 = arith.constant 0 : i32
    %c0_i32_1 = arith.constant 0 : i32
    return %c0_i32, %c0_i32_0 : i32, i32
  }
  func.func @transform_5(%arg0: i32) -> (i32, i32) {
    %c0_i32 = arith.constant 0 : i32
    %c0_i32_0 = arith.constant 0 : i32
    %c0_i32_1 = arith.constant 0 : i32
    return %c0_i32, %c0_i32_0 : i32, i32
  }
  func.func @transform_6(%arg0: i32) -> (i32, i32) {
    %c0_i32 = arith.constant 0 : i32
    %c0_i32_0 = arith.constant 0 : i32
    %c0_i32_1 = arith.constant 0 : i32
    return %c0_i32, %c0_i32_0 : i32, i32
  }
  func.func @transform_7(%arg0: i32) -> (i32, i32) {
    %c0_i32 = arith.constant 0 : i32
    %c0_i32_0 = arith.constant 0 : i32
    %c0_i32_1 = arith.constant 0 : i32
    return %c0_i32, %c0_i32_0 : i32, i32
  }
  func.func @transform_8(%arg0: i32) -> (i32, i32) {
    %c0_i32 = arith.constant 0 : i32
    %c0_i32_0 = arith.constant 0 : i32
    return %arg0, %c0_i32 : i32, i32
  }
}

</mosaic_0001>

<bundles_post_ra>
// kernel: critic_forward.1
= control target key start
LH: loop header
LB: loop body
LE: loop exit
PB: predicated region body
PF: predicated region fallthrough
CT: control target
= control target key end

     0   :  { %vm42_vm0 = vcmask 1043456   ;;  %v789_v0 = vmov 0.0   ;;  %vm790_vm1 = vmmov 0   ;;  %vm38_vm2 = vcmask 64512   ;;  %s1047_s2 = inlined_call_operand.vmem [shape: bf16[24,128], index: 2, kind: input, shape index: {}]   ;;  %s1048_s3 = inlined_call_operand.vmem [shape: bf16[8,128], index: 3, kind: input, shape index: {}]   ;;  %s1049_s1 = inlined_call_operand.vmem [shape: f32[8,8], index: 1, kind: input, shape index: {}]   ;;  %s1050_s5 = inlined_call_operand.vmem [shape: bf16[128,128], index: 5, kind: input, shape index: {}]   ;;  %s1051_s0 = inlined_call_operand.vmem [shape: f32[8,24], index: 0, kind: input, shape index: {}]   ;;  %s1052_s4 = inlined_call_operand.vmem [shape: f32[1,128], index: 4, kind: input, shape index: {}]   ;;  %s1053_s6 = inlined_call_operand.vmem [shape: f32[1,128], index: 6, kind: input, shape index: {}]   ;;  %s1054_s7 = inlined_call_operand.vmem [shape: f32[1,128], index: 7, kind: input, shape index: {}]   ;;  %s1055_s8 = inlined_call_operand.vmem [shape: f32[1,8], index: 8, kind: output, shape index: {}]  }
   0x1   :  { %623 = vmatprep.subr.bf16.mxu1 %v789_v0  ;;  %v37_v1 = vld [vmem:[%s1048_s3] sm:$0xf]  ;;  %625 = vmatprep.mubr.msk.bf16.mxu1 %vm790_vm1, %v789_v0  ;;  %v779_v4 = vld [vmem:[%s1047_s2 + $0x8] ss:$0 sps:$4 sm:$0xff]   ;;  %v879_v12 = vld [vmem:[%s1050_s5 + $0x10] sm:$0xff]   ;;  %vm95_vm3 = vcmask 195584  }
   0x2   :  { %v44_v2 = vsel %vm42_vm0, %v37_v1, 0  ;;  %v35_v3 = vld [vmem:[%s1049_s1] sm:$0xff]  ;;  %637 = vmatprep.subr.bf16.mxu0 %v789_v0  ;;  %653 = vmatprep.mubr.msk.bf16.mxu0 %vm790_vm1, %v789_v0  ;;  %v865_v8 = vld [vmem:[%s1050_s5 + $0x8] sm:$0xff]   ;;  %v100_v9 = vsel %vm42_vm0, %v779_v4, 0  ;;  %v887_v13 = vld [vmem:[%s1050_s5 + $0x18] sm:$0xff]   ;;  %vm534_vm4 = vcmask 57344  }
   0x3   :  { %624 = vmatpush3.bf16.msra.mxu1 %v44_v2  ;;  %v36_v5 = vpack.c.bf16 %v35_v3, %v35_v3  ;;  %v780_v6 = vld [vmem:[%s1047_s2] sm:$0xff]   ;;  %v913_v15 = vld [vmem:[%s1050_s5 + $0x28] sm:$0xff]   ;;  %v923_v16 = vld [vmem:[%s1050_s5 + $0x30] sm:$0xff]  }
   0x4   :  { %629 = vmatprep.subr.bf16.mxu1 %v789_v0  ;;  %v859_v7 = vld [vmem:[%s1050_s5] sm:$0xff]   ;;  %v932_v17 = vld [vmem:[%s1050_s5 + $0x38] sm:$0xff]  }
   0x5   :  { %638 = vmatpush3.bf16.msra.mxu0 %v859_v7  ;;  %v30_v10 = vld [vmem:[%s1051_s0] sm:$0xff] }
   0x6   :  { %626 = vmatmul.mubr.msk.bf16.vlgmr.msra.gmra.mrb[0].mxu1 %vm38_vm2, %v36_v5  ;;  %639 = vmatprep.subr.bf16.mxu0 %v789_v0  ;;  %v31_v11 = vpack.c.bf16 %v30_v10, %v30_v10  ;;  %v905_v14 = vld [vmem:[%s1050_s5 + $0x20] sm:$0xff]  }
   0x7   :  { %630 = vmatpush3.bf16.msra.mxu1 %v780_v6  ;;  %633 = vmatprep.mubr.msk.bf16.mxu1 %vm790_vm1, %v789_v0  ;;  %v544_v23 = vld [vmem:[%s1052_s4] ss:$0 sm:$0xff] }
   0x8   :  { %631 = vmatprep.subr.bf16.mxu1 %v789_v0  ;;  %v962_v31 = vld [vmem:[%s1053_s6] ss:$0 sm:$0xff] }
   0x9   :  { %640 = vmatpush3.bf16.msra.mxu0 %v865_v8 }
   0xa   :  { %641 = vmatprep.subr.bf16.mxu0 %v789_v0 }
   0xb   :  { %632 = vmatpush3.bf16.msra.mxu1 %v100_v9 }
   0xc   :  { %657 = vmatprep.subr.bf16.mxu1 %v789_v0 }
   0xd   :  { %642 = vmatpush3.bf16.msra.mxu0 %v879_v12 }
   0xe   :  { %634 = vmatmul.mubr.msk.bf16.vlgmr.msra.gmra.mrb[4].mxu1 %vm95_vm3, %v31_v11  ;;  %643 = vmatprep.subr.bf16.mxu0 %v789_v0 }
   0xf   :  { %658 = vmatpush3.bf16.msra.mxu1 %v859_v7  ;;  %673 = vmatprep.mubr.msk.bf16.mxu1 %vm790_vm1, %v789_v0 }
  0x10   :  { %659 = vmatprep.subr.bf16.mxu1 %v789_v0 }
  0x11   :  { %644 = vmatpush3.bf16.msra.mxu0 %v887_v13 }
  0x12   :  { %645 = vmatprep.subr.bf16.mxu0 %v789_v0 }
  0x13   :  { %660 = vmatpush3.bf16.msra.mxu1 %v865_v8 }
  0x14   :  { %661 = vmatprep.subr.bf16.mxu1 %v789_v0 }
  0x15   :  { %646 = vmatpush3.bf16.msra.mxu0 %v905_v14 }
  0x16   :  { %647 = vmatprep.subr.bf16.mxu0 %v789_v0 }
  0x17   :  { %662 = vmatpush3.bf16.msra.mxu1 %v879_v12 }
  0x18   :  { %663 = vmatprep.subr.bf16.mxu1 %v789_v0 }
  0x19   :  { %648 = vmatpush3.bf16.msra.mxu0 %v913_v15 }
  0x1a   :  { %649 = vmatprep.subr.bf16.mxu0 %v789_v0 }
  0x1b   :  { %664 = vmatpush3.bf16.msra.mxu1 %v887_v13 }
  0x1c   :  { %665 = vmatprep.subr.bf16.mxu1 %v789_v0 }
  0x1d   :  { %650 = vmatpush3.bf16.msra.mxu0 %v923_v16 }
  0x1e   :  { %651 = vmatprep.subr.bf16.mxu0 %v789_v0 }
  0x1f   :  { %666 = vmatpush3.bf16.msra.mxu1 %v905_v14 }
  0x20   :  { %667 = vmatprep.subr.bf16.mxu1 %v789_v0 }
  0x21   :  { %652 = vmatpush3.bf16.msra.mxu0 %v932_v17 }
  0x22   :  { %677 = vmatprep.subr.bf16.mxu0 %v789_v0 }
  0x23   :  { %668 = vmatpush3.bf16.msra.mxu1 %v913_v15 }
  0x24   :  { %669 = vmatprep.subr.bf16.mxu1 %v789_v0 }
  0x27   :  { %670 = vmatpush3.bf16.msra.mxu1 %v923_v16 }
  0x28   :  { %671 = vmatprep.subr.bf16.mxu1 %v789_v0 }
  0x2b   :  { %672 = vmatpush3.bf16.msra.mxu1 %v932_v17 }
  0x2c   :  { %697 = vmatprep.subr.bf16.mxu1 %v789_v0 }
  0xd9   :  { %v80_v18 = vpop.f32.mrb[0].mxu1 }
  0xda   :  { %v627_v19 = vpop.f32.mrb[1].mxu1 }
  0xdb   :  { %v83_v20 = vpop.f32.mrb[2].mxu1 }
  0xdc   :  { %v628_v21 = vpop.f32.mrb[3].mxu1 }
  0xe1   :  { %v136_v22 = vpop.f32.mrb[4].mxu1 }
  0xe2   :  { %v137_v24 = vadd.f32 %v136_v22, %v80_v18  ;;  %v635_v25 = vpop.f32.mrb[5].mxu1  ;;  %v527_v18 = vlaneseq }
  0xe3   :  { %v139_v26 = vpop.f32.mrb[6].mxu1 }
  0xe4   :  { %v149_v27 = vadd.f32 %v544_v23, %v137_v24  ;;  %v636_v28 = vpop.f32.mrb[7].mxu1  ;;  %v528_v19 = vand.u32 127, %v527_v18  ;;  %v530_v20 = vshrl.u32 %v527_v18, 7 }
  0xe6   :  { %v150_v29 = vmax.f32 %v149_v27, 0.0  ;;  %v531_v21 = vsub.s32 %v528_v19, %v530_v20 }
  0xe8   :  { %v168_v30 = vpack.c.bf16 %v150_v29, %v150_v29 }
  0xea   :  { %654 = vmatmul.mubr.bf16.vlgmr.msra.gmra.mrb[0].mxu0 %v168_v30 }
  0xeb   :  { %678 = vmatpush3.bf16.msra.mxu0 %v859_v7  ;;  %693 = vmatprep.mubr.msk.bf16.mxu0 %vm790_vm1, %v789_v0 }
  0xec   :  { %679 = vmatprep.subr.bf16.mxu0 %v789_v0 }
  0xef   :  { %680 = vmatpush3.bf16.msra.mxu0 %v865_v8 }
  0xf0   :  { %681 = vmatprep.subr.bf16.mxu0 %v789_v0 }
  0xf3   :  { %682 = vmatpush3.bf16.msra.mxu0 %v879_v12 }
  0xf4   :  { %683 = vmatprep.subr.bf16.mxu0 %v789_v0 }
  0xf7   :  { %684 = vmatpush3.bf16.msra.mxu0 %v887_v13 }
  0xf8   :  { %685 = vmatprep.subr.bf16.mxu0 %v789_v0 }
  0xfb   :  { %686 = vmatpush3.bf16.msra.mxu0 %v905_v14 }
  0xfc   :  { %687 = vmatprep.subr.bf16.mxu0 %v789_v0 }
  0xff   :  { %688 = vmatpush3.bf16.msra.mxu0 %v913_v15 }
 0x100   :  { %689 = vmatprep.subr.bf16.mxu0 %v789_v0 }
 0x103   :  { %690 = vmatpush3.bf16.msra.mxu0 %v923_v16 }
 0x104   :  { %691 = vmatprep.subr.bf16.mxu0 %v789_v0 }
 0x107   :  { %692 = vmatpush3.bf16.msra.mxu0 %v932_v17 }
 0x108   :  { %717 = vmatprep.subr.bf16.mxu0 %v789_v0 }
 0x1bd   :  { %v257_v32 = vpop.f32.mrb[0].mxu0 }
 0x1be   :  { %v258_v33 = vadd.f32 %v962_v31, %v257_v32  ;;  %v655_v34 = vpop.f32.mrb[1].mxu0 }
 0x1bf   :  { %v260_v35 = vpop.f32.mrb[2].mxu0 }
 0x1c0   :  { %v263_v36 = vmax.f32 %v258_v33, 0.0  ;;  %v656_v37 = vpop.f32.mrb[3].mxu0 }
 0x1c2   :  { %v264_v38 = vpack.c.bf16 %v263_v36, %v263_v36 }
 0x1c4   :  { %674 = vmatmul.mubr.bf16.vlgmr.msra.gmra.mrb[8].mxu1 %v264_v38 }
 0x1c5   :  { %698 = vmatpush3.bf16.msra.mxu1 %v859_v7  ;;  %713 = vmatprep.mubr.msk.bf16.mxu1 %vm790_vm1, %v789_v0 }
 0x1c6   :  { %699 = vmatprep.subr.bf16.mxu1 %v789_v0 }
 0x1c9   :  { %700 = vmatpush3.bf16.msra.mxu1 %v865_v8 }
 0x1ca   :  { %701 = vmatprep.subr.bf16.mxu1 %v789_v0 }
 0x1cd   :  { %702 = vmatpush3.bf16.msra.mxu1 %v879_v12 }
 0x1ce   :  { %703 = vmatprep.subr.bf16.mxu1 %v789_v0 }
 0x1d1   :  { %704 = vmatpush3.bf16.msra.mxu1 %v887_v13 }
 0x1d2   :  { %705 = vmatprep.subr.bf16.mxu1 %v789_v0 }
 0x1d5   :  { %706 = vmatpush3.bf16.msra.mxu1 %v905_v14 }
 0x1d6   :  { %707 = vmatprep.subr.bf16.mxu1 %v789_v0 }
 0x1d9   :  { %708 = vmatpush3.bf16.msra.mxu1 %v913_v15 }
 0x1da   :  { %709 = vmatprep.subr.bf16.mxu1 %v789_v0 }
 0x1dd   :  { %710 = vmatpush3.bf16.msra.mxu1 %v923_v16 }
 0x1de   :  { %711 = vmatprep.subr.bf16.mxu1 %v789_v0 }
 0x1e1   :  { %712 = vmatpush3.bf16.msra.mxu1 %v932_v17 }
 0x1e2   :  { %737 = vmatprep.subr.bf16.mxu1 %v789_v0 }
 0x297   :  { %v299_v39 = vpop.f32.mrb[8].mxu1 }
 0x298   :  { %v300_v40 = vadd.f32 %v962_v31, %v299_v39  ;;  %v675_v41 = vpop.f32.mrb[9].mxu1 }
 0x299   :  { %v302_v42 = vpop.f32.mrb[10].mxu1 }
 0x29a   :  { %v305_v43 = vmax.f32 %v300_v40, 0.0  ;;  %v676_v44 = vpop.f32.mrb[11].mxu1 }
 0x29c   :  { %v306_v45 = vpack.c.bf16 %v305_v43, %v305_v43 }
 0x29e   :  { %694 = vmatmul.mubr.bf16.vlgmr.msra.gmra.mrb[4].mxu0 %v306_v45 }
 0x29f   :  { %718 = vmatpush3.bf16.msra.mxu0 %v859_v7  ;;  %733 = vmatprep.mubr.msk.bf16.mxu0 %vm790_vm1, %v789_v0 }
 0x2a0   :  { %719 = vmatprep.subr.bf16.mxu0 %v789_v0 }
 0x2a3   :  { %720 = vmatpush3.bf16.msra.mxu0 %v865_v8 }
 0x2a4   :  { %721 = vmatprep.subr.bf16.mxu0 %v789_v0 }
 0x2a7   :  { %722 = vmatpush3.bf16.msra.mxu0 %v879_v12 }
 0x2a8   :  { %723 = vmatprep.subr.bf16.mxu0 %v789_v0 }
 0x2ab   :  { %724 = vmatpush3.bf16.msra.mxu0 %v887_v13 }
 0x2ac   :  { %725 = vmatprep.subr.bf16.mxu0 %v789_v0 }
 0x2af   :  { %726 = vmatpush3.bf16.msra.mxu0 %v905_v14 }
 0x2b0   :  { %727 = vmatprep.subr.bf16.mxu0 %v789_v0 }
 0x2b3   :  { %728 = vmatpush3.bf16.msra.mxu0 %v913_v15 }
 0x2b4   :  { %729 = vmatprep.subr.bf16.mxu0 %v789_v0 }
 0x2b7   :  { %730 = vmatpush3.bf16.msra.mxu0 %v923_v16 }
 0x2b8   :  { %731 = vmatprep.subr.bf16.mxu0 %v789_v0 }
 0x2bb   :  { %732 = vmatpush3.bf16.msra.mxu0 %v932_v17 }
 0x2bc   :  { %757 = vmatprep.subr.bf16.mxu0 %v789_v0 }
 0x371   :  { %v341_v46 = vpop.f32.mrb[4].mxu0 }
 0x372   :  { %v342_v47 = vadd.f32 %v962_v31, %v341_v46  ;;  %v695_v48 = vpop.f32.mrb[5].mxu0 }
 0x373   :  { %v344_v49 = vpop.f32.mrb[6].mxu0 }
 0x374   :  { %v347_v50 = vmax.f32 %v342_v47, 0.0  ;;  %v696_v51 = vpop.f32.mrb[7].mxu0 }
 0x376   :  { %v348_v52 = vpack.c.bf16 %v347_v50, %v347_v50 }
 0x378   :  { %714 = vmatmul.mubr.bf16.vlgmr.msra.gmra.mrb[12].mxu1 %v348_v52 }
 0x379   :  { %738 = vmatpush3.bf16.msra.mxu1 %v859_v7  ;;  %753 = vmatprep.mubr.msk.bf16.mxu1 %vm790_vm1, %v789_v0 }
 0x37a   :  { %739 = vmatprep.subr.bf16.mxu1 %v789_v0 }
 0x37d   :  { %740 = vmatpush3.bf16.msra.mxu1 %v865_v8 }
 0x37e   :  { %741 = vmatprep.subr.bf16.mxu1 %v789_v0 }
 0x381   :  { %742 = vmatpush3.bf16.msra.mxu1 %v879_v12 }
 0x382   :  { %743 = vmatprep.subr.bf16.mxu1 %v789_v0 }
 0x385   :  { %744 = vmatpush3.bf16.msra.mxu1 %v887_v13 }
 0x386   :  { %745 = vmatprep.subr.bf16.mxu1 %v789_v0 }
 0x389   :  { %746 = vmatpush3.bf16.msra.mxu1 %v905_v14 }
 0x38a   :  { %747 = vmatprep.subr.bf16.mxu1 %v789_v0 }
 0x38d   :  { %748 = vmatpush3.bf16.msra.mxu1 %v913_v15 }
 0x38e   :  { %749 = vmatprep.subr.bf16.mxu1 %v789_v0 }
 0x391   :  { %750 = vmatpush3.bf16.msra.mxu1 %v923_v16 }
 0x392   :  { %751 = vmatprep.subr.bf16.mxu1 %v789_v0 }
 0x395   :  { %752 = vmatpush3.bf16.msra.mxu1 %v932_v17 }
 0x44b   :  { %v383_v53 = vpop.f32.mrb[12].mxu1 }
 0x44c   :  { %v384_v54 = vadd.f32 %v962_v31, %v383_v53  ;;  %v715_v55 = vpop.f32.mrb[13].mxu1 }
 0x44d   :  { %v386_v56 = vpop.f32.mrb[14].mxu1 }
 0x44e   :  { %v389_v57 = vmax.f32 %v384_v54, 0.0  ;;  %v716_v58 = vpop.f32.mrb[15].mxu1 }
 0x450   :  { %v390_v59 = vpack.c.bf16 %v389_v57, %v389_v57 }
 0x452   :  { %734 = vmatmul.mubr.bf16.vlgmr.msra.gmra.mrb[8].mxu0 %v390_v59 }
 0x453   :  { %758 = vmatpush3.bf16.msra.mxu0 %v859_v7  ;;  %773 = vmatprep.mubr.msk.bf16.mxu0 %vm790_vm1, %v789_v0 }
 0x454   :  { %759 = vmatprep.subr.bf16.mxu0 %v789_v0 }
 0x457   :  { %760 = vmatpush3.bf16.msra.mxu0 %v865_v8 }
 0x458   :  { %761 = vmatprep.subr.bf16.mxu0 %v789_v0 }
 0x45b   :  { %762 = vmatpush3.bf16.msra.mxu0 %v879_v12 }
 0x45c   :  { %763 = vmatprep.subr.bf16.mxu0 %v789_v0 }
 0x45f   :  { %764 = vmatpush3.bf16.msra.mxu0 %v887_v13 }
 0x460   :  { %765 = vmatprep.subr.bf16.mxu0 %v789_v0 }
 0x463   :  { %766 = vmatpush3.bf16.msra.mxu0 %v905_v14  ;;  %v554_v14 = vld [vmem:[%s1054_s7] ss:$0 sm:$0xff] }
 0x464   :  { %767 = vmatprep.subr.bf16.mxu0 %v789_v0 }
 0x467   :  { %768 = vmatpush3.bf16.msra.mxu0 %v913_v15 }
 0x468   :  { %769 = vmatprep.subr.bf16.mxu0 %v789_v0 }
 0x46b   :  { %770 = vmatpush3.bf16.msra.mxu0 %v923_v16 }
 0x46c   :  { %771 = vmatprep.subr.bf16.mxu0 %v789_v0 }
 0x46f   :  { %772 = vmatpush3.bf16.msra.mxu0 %v932_v17 }
 0x525   :  { %v425_v60 = vpop.f32.mrb[8].mxu0 }
 0x526   :  { %v426_v61 = vadd.f32 %v962_v31, %v425_v60  ;;  %v735_v62 = vpop.f32.mrb[9].mxu0 }
 0x527   :  { %v428_v63 = vpop.f32.mrb[10].mxu0 }
 0x528   :  { %v431_v1 = vmax.f32 %v426_v61, 0.0  ;;  %v736_v2 = vpop.f32.mrb[11].mxu0 }
 0x52a   :  { %v432_v3 = vpack.c.bf16 %v431_v1, %v431_v1 }
 0x52c   :  { %754 = vmatmul.mubr.bf16.vlgmr.msra.gmra.mrb[16].mxu1 %v432_v3 }
 0x5ff   :  { %v467_v4 = vpop.f32.mrb[16].mxu1 }
 0x600   :  { %v468_v5 = vadd.f32 %v962_v31, %v467_v4  ;;  %v755_v6 = vpop.f32.mrb[17].mxu1 }
 0x601   :  { %v470_v7 = vpop.f32.mrb[18].mxu1 }
 0x602   :  { %v473_v8 = vmax.f32 %v468_v5, 0.0  ;;  %v756_v9 = vpop.f32.mrb[19].mxu1 }
 0x604   :  { %v474_v10 = vpack.c.bf16 %v473_v8, %v473_v8 }
 0x606   :  { %774 = vmatmul.mubr.bf16.vlgmr.msra.gmra.mrb[12].mxu0 %v474_v10 }
 0x6d9   :  { %v509_v0 = vpop.f32.mrb[12].mxu0 }
 0x6da   :  { %v510_v11 = vadd.f32 %v962_v31, %v509_v0  ;;  %v775_v12 = vpop.f32.mrb[13].mxu0 }
 0x6db   :  { %v512_v13 = vpop.f32.mrb[14].mxu0 }
 0x6dc   :  { %v515_v15 = vmax.f32 %v510_v11, 0.0  ;;  %v776_v16 = vpop.f32.mrb[15].mxu0 }
 0x6de   :  { %v523_v17 = vmul.f32 %v554_v14, %v515_v15 }
 0x6e0   :  { %524 = vadd.xlane.f32.xlu0 %v523_v17 }
 0x76d   :  { %v525_v22 = vpop.xlane.xlu0 %524 }
 0x76e   :  { %v532_v23 = vrot.slane %v525_v22, %v531_v21 }
 0x770   :  { %535 = vst.msk [vmem:[%s1055_s8] sm:$0x1] %vm534_vm4, %v532_v23 }

</bundles_post_ra>
